<compile_context>
chip_gen: v7x
topology: tpu7x:2x2x1
jax: 0.10.0
libtpu: 0.0.40
codegen_flags: <defaults>
</compile_context>

<pallas_src>
import math
import functools

import jax
import jax.numpy as jnp
from jax import lax
from jax.experimental import pallas as pl
from jax.experimental.pallas import tpu as pltpu


# ------------------------------ helpers ------------------------------------

def _round_up(x, m):
    return (x + m - 1) // m * m


def _tile(dim, preferred, quantum):
    """Largest multiple of `quantum` <= preferred that divides round_up(dim, quantum)."""
    dim_p = _round_up(dim, quantum)
    t = max(quantum, min(preferred, dim_p) // quantum * quantum)
    while dim_p % t != 0:
        t -= quantum
    return t


def _seq_tile(s, preferred):
    """Largest candidate sequence tile that divides s, else the whole s."""
    for t in (preferred, 256, 128, 64, 32, 16, 8):
        if s >= t and s % t == 0:
            return t
    return s


def _heads_per_block(num_heads, head_dim):
    """Heads packed per attention grid step so block lane width is 128-dense
    (or the full merged width when that is impossible)."""
    if head_dim % 128 == 0:
        return 1
    if 128 % head_dim == 0:
        g = 128 // head_dim
        if num_heads % g == 0:
            return g
    return num_heads


# ----------------------- tiled linear (matmul + bias) -----------------------

def _matmul_bias_kernel(x_ref, w_ref, b_ref, o_ref, acc_ref):
    # grid = (M/bm, N/bn, K/bk); K is the reduction axis (last, "arbitrary").
    @pl.when(pl.program_id(2) == 0)
    def _():
        acc_ref[...] = jnp.zeros_like(acc_ref)

    acc_ref[...] += jnp.dot(x_ref[...], w_ref[...],
                            preferred_element_type=jnp.float32)

    @pl.when(pl.program_id(2) == pl.num_programs(2) - 1)
    def _():
        o_ref[...] = (acc_ref[...] + b_ref[...].astype(jnp.float32)
                      ).astype(o_ref.dtype)


def pallas_linear(x, w, b, *, bm=512, bn=512, bk=1024):
    """x: (M, K); w: (K, N) (input-major, pre-transposed at init); b: (N,)."""
    M, K = x.shape
    Kw, N = w.shape
    assert Kw == K

    bm = _tile(M, bm, 8)
    bn = _tile(N, bn, 128)
    bk = _tile(K, bk, 128)
    Mp, Kp, Np = _round_up(M, bm), _round_up(K, bk), _round_up(N, bn)

    xp = x if (Mp, Kp) == (M, K) else jnp.pad(x, ((0, Mp - M), (0, Kp - K)))
    wp = w if (Kp, Np) == (K, N) else jnp.pad(w, ((0, Kp - K), (0, Np - N)))
    bp = b.reshape(1, N)
    if Np != N:
        bp = jnp.pad(bp, ((0, 0), (0, Np - N)))

    out = pl.pallas_call(
        _matmul_bias_kernel,
        out_shape=jax.ShapeDtypeStruct((Mp, Np), x.dtype),
        grid_spec=pltpu.PrefetchScalarGridSpec(
            num_scalar_prefetch=0,
            grid=(Mp // bm, Np // bn, Kp // bk),
            in_specs=[
                pl.BlockSpec((bm, bk), lambda i, j, kk: (i, kk)),
                pl.BlockSpec((bk, bn), lambda i, j, kk: (kk, j)),
                pl.BlockSpec((1, bn), lambda i, j, kk: (0, j)),
            ],
            out_specs=pl.BlockSpec((bm, bn), lambda i, j, kk: (i, j)),
            scratch_shapes=[pltpu.VMEM((bm, bn), jnp.float32)],
        ),
        compiler_params=pltpu.CompilerParams(
            dimension_semantics=("parallel", "parallel", "arbitrary"),
            vmem_limit_bytes=32 * 1024 * 1024,
        ),
    )(xp, wp, bp)

    if (Mp, Np) != (M, N):
        out = out[:M, :N]
    return out


# ------------------- flash-style scaled-dot-product attention ----------------

def _flash_attn_kernel(*refs, heads_per_block, head_dim, has_mask):
    if has_mask:
        q_ref, k_ref, v_ref, mask_ref, o_ref, m_sc, l_sc, acc_sc = refs
    else:
        q_ref, k_ref, v_ref, o_ref, m_sc, l_sc, acc_sc = refs
    G, hd = heads_per_block, head_dim
    tq = q_ref.shape[0]
    tk = k_ref.shape[0]

    @pl.when(pl.program_id(3) == 0)
    def _():
        m_sc[...] = jnp.full_like(m_sc, -jnp.inf)
        l_sc[...] = jnp.zeros_like(l_sc)
        acc_sc[...] = jnp.zeros_like(acc_sc)

    # Merged-head (tq, G*hd) tiles -> (G, tq, hd) batch-leading views (VMEM-local).
    qh = jnp.swapaxes(q_ref[...].reshape(tq, G, hd), 0, 1)   # (G, tq, hd)
    kh = jnp.swapaxes(k_ref[...].reshape(tk, G, hd), 0, 1)   # (G, tk, hd)
    # QK^T per head; operands stay in the input dtype, f32 accumulation on the MXU.
    # NOTE: 1/sqrt(head_dim) is already folded into the query projection weights.
    s = jnp.einsum("gqd,gkd->gqk", qh, kh,
                   preferred_element_type=jnp.float32)       # (G, tq, tk)
    if has_mask:
        s = s + mask_ref[...]          # (mq, tk) f32, broadcasts over heads/rows

    m_prev = m_sc[...]
    m_new = jnp.maximum(m_prev, jnp.max(s, axis=-1, keepdims=True))
    # Guard fully -inf rows so exp(-inf - -inf) never produces NaN.
    m_safe = jnp.where(m_new == -jnp.inf, 0.0, m_new)
    alpha = jnp.exp(m_prev - m_safe)
    p = jnp.exp(s - m_safe)
    l_sc[...] = alpha * l_sc[...] + jnp.sum(p, axis=-1, keepdims=True)

    vh = jnp.swapaxes(v_ref[...].reshape(tk, G, hd), 0, 1)   # (G, tk, hd)
    acc_sc[...] = alpha * acc_sc[...] + jnp.einsum(
        "gqk,gkd->gqd", p.astype(v_ref.dtype), vh,
        preferred_element_type=jnp.float32)
    m_sc[...] = m_new

    @pl.when(pl.program_id(3) == pl.num_programs(3) - 1)
    def _():
        l = l_sc[...]
        l = jnp.where(l == 0.0, 1.0, l)            # fully-masked rows -> output 0
        r = pl.reciprocal(l, approx=True)          # EUP slot
        r = r * (2.0 - l * r)                      # one Newton step -> ~f32 accurate
        o = acc_sc[...] * r                        # (G, tq, hd)
        o_ref[...] = jnp.swapaxes(o, 0, 1).reshape(tq, G * hd).astype(o_ref.dtype)


def pallas_attention(q, k, v, *, num_heads, head_dim, attention_mask=None,
                     q_head_offset=0, k_head_offset=0, v_head_offset=0,
                     tq=128, tk=256):
    """Flash attention over merged-head (B, S, width) arrays.

    Head h of `q` lives at columns [(q_head_offset + h)*head_dim, ...) of q's last
    axis (same for k/v).  For the fused self-attention fast path q, k, v are the
    SAME (B, S, 3*D) buffer with head offsets (0, H, 2H).  Output is the merged
    (B, S_q, num_heads*head_dim) context — no head split/merge transposes in HBM.
    """
    B, Sq, _ = q.shape
    Bk, Sk, _ = k.shape
    assert Bk == B and v.shape[:2] == (B, Sk)
    H, hd = num_heads, head_dim
    D = H * hd

    G = _heads_per_block(H, hd)
    bw = G * hd                                   # lane width of each q/k/v/o block
    for a in (q, k, v):                           # (8,128) layout rule on the last dim
        assert bw % 128 == 0 or bw == a.shape[-1], (bw, a.shape)
    for off in (q_head_offset, k_head_offset, v_head_offset):
        assert off % G == 0

    tq = _seq_tile(Sq, tq)
    tk = _seq_tile(Sk, tk)

    has_mask = attention_mask is not None
    if has_mask:
        mask = jnp.asarray(attention_mask, jnp.float32)
        mask = mask.reshape((1,) * (4 - mask.ndim) + tuple(mask.shape))
        Bm, Hm, Sqm, Skm = mask.shape
        assert Skm == Sk and Sqm in (1, Sq) and Bm in (1, B)
        if Hm != 1 and not (Hm == H and G == 1):
            # TODO(synk): per-head masks with packed heads need a grouped mask view.
            raise NotImplementedError("per-head attention_mask requires head_dim >= 128")
        # The mask block's last dim is tk: keep it 128-aligned or the full key length.
        if tk % 128 != 0 and tk != Sk:
            tk = Sk
        mq = tq if Sqm == Sq else 1

    nq, nk = Sq // tq, Sk // tk
    qo, ko, vo = q_head_offset // G, k_head_offset // G, v_head_offset // G

    q_spec = pl.BlockSpec((pl.Squeezed(), tq, bw),
                          lambda b, g, qi, ki: (b, qi, g + qo))
    k_spec = pl.BlockSpec((pl.Squeezed(), tk, bw),
                          lambda b, g, qi, ki: (b, ki, g + ko))
    v_spec = pl.BlockSpec((pl.Squeezed(), tk, bw),
                          lambda b, g, qi, ki: (b, ki, g + vo))
    o_spec = pl.BlockSpec((pl.Squeezed(), tq, bw),
                          lambda b, g, qi, ki: (b, qi, g))

    scratch = [pltpu.VMEM((G, tq, 1), jnp.float32),    # running max  m
               pltpu.VMEM((G, tq, 1), jnp.float32),    # running sum  l
               pltpu.VMEM((G, tq, hd), jnp.float32)]   # un-normalized output acc

    if has_mask:
        mask_spec = pl.BlockSpec(
            (pl.Squeezed(), pl.Squeezed(), mq, tk),
            lambda b, g, qi, ki: (b if Bm != 1 else 0,
                                  g if Hm != 1 else 0,
                                  qi if Sqm != 1 else 0,
                                  ki))
        in_specs = [q_spec, k_spec, v_spec, mask_spec]
        args = (q, k, v, mask)
    else:
        in_specs = [q_spec, k_spec, v_spec]
        args = (q, k, v)

    kernel = functools.partial(_flash_attn_kernel, heads_per_block=G,
                               head_dim=hd, has_mask=has_mask)

    return pl.pallas_call(
        kernel,
        out_shape=jax.ShapeDtypeStruct((B, Sq, D), q.dtype),
        grid_spec=pltpu.PrefetchScalarGridSpec(
            num_scalar_prefetch=0,
            grid=(B, H // G, nq, nk),
            in_specs=in_specs,
            out_specs=o_spec,
            scratch_shapes=scratch,
        ),
        compiler_params=pltpu.CompilerParams(
            dimension_semantics=("parallel", "parallel", "parallel", "arbitrary"),
            vmem_limit_bytes=32 * 1024 * 1024,
        ),
    )(*args)


# --------------------------- Module-level wrapper ---------------------------

def init_mha_params(key, d_model, num_heads, dtype=jnp.float32):
    """nn.Linear-equivalent params, stored input-major (D_in, D_out).

    Also stores the query weights with the 1/sqrt(head_dim) softmax scale folded
    in, and a fused QKV weight/bias for the self-attention fast path, so the
    per-call kernels never transpose weights nor rescale scores.
    """
    head_dim = d_model // num_heads
    bound = 1.0 / math.sqrt(d_model)
    ks = jax.random.split(key, 8)

    def lin(kw, kb):
        w = jax.random.uniform(kw, (d_model, d_model), jnp.float32, -bound, bound)
        b = jax.random.uniform(kb, (d_model,), jnp.float32, -bound, bound)
        return w.astype(dtype), b.astype(dtype)

    p = {"query": lin(ks[0], ks[1]),
         "key":   lin(ks[2], ks[3]),
         "value": lin(ks[4], ks[5]),
         "out":   lin(ks[6], ks[7])}

    scale = 1.0 / math.sqrt(head_dim)
    wq, bq = p["query"]
    wq_s = (wq.astype(jnp.float32) * scale).astype(dtype)
    bq_s = (bq.astype(jnp.float32) * scale).astype(dtype)
    p["query_scaled"] = (wq_s, bq_s)
    p["qkv_scaled"] = (
        jnp.concatenate([wq_s, p["key"][0], p["value"][0]], axis=1),
        jnp.concatenate([bq_s, p["key"][1], p["value"][1]], axis=0))
    return p


def multi_head_attention(params, query, key, value, num_heads, attention_mask=None):
    """Forward pass equivalent to MultiHeadAttention.forward."""
    B, Sq, D = query.shape
    H = num_heads
    hd = D // H
    assert hd * H == D, "d_model must be divisible by num_heads"

    dtype = params["out"][0].dtype
    G = _heads_per_block(H, hd)
    self_attention = (query is key) and (key is value)
    # Direct column-offset consumption of the fused (B,S,3D) buffer needs a
    # 128-aligned head-group width (otherwise its last dim breaks the lane layout).
    fuse_qkv = self_attention and ((G * hd) % 128 == 0)

    if fuse_qkv:
        x = query.astype(dtype).reshape(B * Sq, D)
        w_qkv, b_qkv = params["qkv_scaled"]
        qkv = pallas_linear(x, w_qkv, b_qkv).reshape(B, Sq, 3 * D)   # free reshape
        ctx = pallas_attention(qkv, qkv, qkv, num_heads=H, head_dim=hd,
                               attention_mask=attention_mask,
                               q_head_offset=0, k_head_offset=H,
                               v_head_offset=2 * H)
    else:
        Skv = key.shape[1]
        q2 = pallas_linear(query.astype(dtype).reshape(B * Sq, D),
                           *params["query_scaled"]).reshape(B, Sq, D)
        k2 = pallas_linear(key.astype(dtype).reshape(B * Skv, D),
                           *params["key"]).reshape(B, Skv, D)
        v2 = pallas_linear(value.astype(dtype).reshape(B * Skv, D),
                           *params["value"]).reshape(B, Skv, D)
        ctx = pallas_attention(q2, k2, v2, num_heads=H, head_dim=hd,
                               attention_mask=attention_mask)

    out = pallas_linear(ctx.reshape(B * Sq, D), *params["out"])
    return out.reshape(B, Sq, D)


# ------------------------------ pure-JAX reference ---------------------------

def ref_mha(params, q_in, k_in, v_in, num_heads, mask=None):
    B, S, D = q_in.shape
    hd = D // num_heads
    f32 = jnp.float32

    def lin(x, wb):
        w, b = wb
        return x.astype(f32) @ w.astype(f32) + b.astype(f32)

    def split(x, s):
        return x.reshape(B, s, num_heads, hd).transpose(0, 2, 1, 3)

    Skv = k_in.shape[1]
    q = split(lin(q_in, params["query"]), S)
    k = split(lin(k_in, params["key"]), Skv)
    v = split(lin(v_in, params["value"]), Skv)
    s = jnp.einsum("bhqd,bhkd->bhqk", q, k) / math.sqrt(hd)
    if mask is not None:
        s = s + mask.astype(f32)
    p = jax.nn.softmax(s, axis=-1)
    ctx = jnp.einsum("bhqk,bhkd->bhqd", p, v).transpose(0, 2, 1, 3).reshape(B, S, D)
    w_o, b_o = params["out"]
    return ctx @ w_o.astype(f32) + b_o.astype(f32)


# --------------------------------- Demo -------------------------------------

if __name__ == "__main__":
    root = jax.random.PRNGKey(0)
    kp_a, kp_b, kx, kk, kv, kxb = jax.random.split(root, 6)

    # (a) module-spec-sized config: d_model=32, heads=4 (head_dim=8), B=2, S=8.
    #     Exercises the packed-head (G=4) kernel and the separate-projection path.
    d_model, num_heads, B, S = 32, 4, 2, 8
    params_a = init_mha_params(kp_a, d_model, num_heads)
    x = jax.random.normal(kx, (B, S, d_model), jnp.float32)
    k_in = jax.random.normal(kk, (B, S, d_model), jnp.float32)
    v_in = jax.random.normal(kv, (B, S, d_model), jnp.float32)
    causal = jnp.where(jnp.arange(S)[:, None] >= jnp.arange(S)[None, :],
                       0.0, -1e9).reshape(1, 1, S, S).astype(jnp.float32)

    out_self = multi_head_attention(params_a, x, x, x, num_heads, causal)
    out_cross = multi_head_attention(params_a, x, k_in, v_in, num_heads)
    out_self, out_cross = jax.block_until_ready((out_self, out_cross))
    assert out_self.shape == (B, S, d_model) and out_cross.shape == (B, S, d_model)
    assert jnp.allclose(out_self, ref_mha(params_a, x, x, x, num_heads, causal),
                        atol=2e-4, rtol=2e-4)
    assert jnp.allclose(out_cross, ref_mha(params_a, x, k_in, v_in, num_heads),
                        atol=2e-4, rtol=2e-4)

    # (b) lane-aligned config (head_dim=128): fused QKV projection consumed
    #     directly from the (B, S, 3D) buffer via column offsets (no slices,
    #     no head split/merge relayouts), f32.
    d_model_b, num_heads_b, Sb = 256, 2, 128
    params_b = init_mha_params(kp_b, d_model_b, num_heads_b)
    xb = jax.random.normal(kxb, (B, Sb, d_model_b), jnp.float32)
    causal_b = jnp.where(jnp.arange(Sb)[:, None] >= jnp.arange(Sb)[None, :],
                         0.0, -1e9).reshape(1, 1, Sb, Sb).astype(jnp.float32)
    out_b = jax.block_until_ready(
        multi_head_attention(params_b, xb, xb, xb, num_heads_b, causal_b))
    assert jnp.allclose(out_b, ref_mha(params_b, xb, xb, xb, num_heads_b, causal_b),
                        atol=2e-4, rtol=2e-4)

    # (c) same config with bf16 weights/activations (bf16 MXU operands, f32 accum),
    #     checked loosely against an f32-math reference that uses the same bf16 params.
    params_c = init_mha_params(kp_b, d_model_b, num_heads_b, dtype=jnp.bfloat16)
    xc = xb.astype(jnp.bfloat16)
    out_c = jax.block_until_ready(
        multi_head_attention(params_c, xc, xc, xc, num_heads_b, causal_b))
    ref_c = ref_mha(params_c, xc, xc, xc, num_heads_b, causal_b)
    assert bool(jnp.all(jnp.isfinite(out_c.astype(jnp.float32))))
    assert jnp.allclose(out_c.astype(jnp.float32), ref_c, atol=5e-2, rtol=5e-2)

    print("KERNEL_OK")
</pallas_src>

<mosaic_0001>
module attributes {stable_mosaic.version = 11 : i64} {
  func.func @_matmul_bias_kernel(%arg0: i32, %arg1: i32, %arg2: i32, %arg3: memref<16x128xf32, #tpu.memory_space<vmem>>, %arg4: memref<128x128xf32, #tpu.memory_space<vmem>>, %arg5: memref<1x128xf32, #tpu.memory_space<vmem>>, %arg6: memref<16x128xf32, #tpu.memory_space<vmem>>, %arg7: memref<16x128xf32, #tpu.memory_space<vmem>>) attributes {dimension_semantics = [#tpu.dimension_semantics<parallel>, #tpu.dimension_semantics<parallel>, #tpu.dimension_semantics<arbitrary>], iteration_bounds = array<i64: 1, 1, 1>, scalar_prefetch = 0 : i64, scratch_operands = 1 : i64, tpu.core_type = #tpu.core_type<tc>, window_params = [{transform_indices = @transform_0, window_bounds = array<i64: 16, 128>}, {transform_indices = @transform_1, window_bounds = array<i64: 128, 128>}, {transform_indices = @transform_2, window_bounds = array<i64: 1, 128>}, {transform_indices = @transform_3, window_bounds = array<i64: 16, 128>}]} {
    %c0_i32 = arith.constant 0 : i32
    %0 = arith.cmpi eq, %arg2, %c0_i32 : i32
    %1 = arith.extui %0 : i1 to i32
    %c0_i32_0 = arith.constant 0 : i32
    %2 = arith.cmpi ne, %1, %c0_i32_0 : i32
    scf.if %2 {
      %cst_10 = arith.constant 0.000000e+00 : f32
      %12 = vector.broadcast %cst_10 : f32 to vector<16x128xf32>
      %c0_11 = arith.constant 0 : index
      %c0_12 = arith.constant 0 : index
      %13 = vector.load %arg7[%c0_11, %c0_12] : memref<16x128xf32, #tpu.memory_space<vmem>>, vector<16x128xf32>
      tpu.vector_store %arg7[%c0_11, %c0_12], %12 {strides = array<i32>} : memref<16x128xf32, #tpu.memory_space<vmem>>, vector<16x128xf32>,
    } else {
    }
    %c0 = arith.constant 0 : index
    %c0_1 = arith.constant 0 : index
    %3 = vector.load %arg7[%c0, %c0_1] : memref<16x128xf32, #tpu.memory_space<vmem>>, vector<16x128xf32>
    %c0_2 = arith.constant 0 : index
    %c0_3 = arith.constant 0 : index
    %4 = vector.load %arg3[%c0_2, %c0_3] : memref<16x128xf32, #tpu.memory_space<vmem>>, vector<16x128xf32>
    %c0_4 = arith.constant 0 : index
    %c0_5 = arith.constant 0 : index
    %5 = vector.load %arg4[%c0_4, %c0_5] : memref<128x128xf32, #tpu.memory_space<vmem>>, vector<128x128xf32>
    %cst = arith.constant dense<0.000000e+00> : vector<16x128xf32>
    %6 = tpu.matmul %4, %5, %cst {dimension_numbers = #tpu.dot_dimension_numbers<[1], [0], [0], [1], [0, 0, 1, 1], [], []>} : vector<16x128xf32>, vector<128x128xf32>, vector<16x128xf32> -> vector<16x128xf32>
    %7 = arith.addf %3, %6 : vector<16x128xf32>
    %c0_6 = arith.constant 0 : index
    %c0_7 = arith.constant 0 : index
    %8 = vector.load %arg7[%c0_6, %c0_7] : memref<16x128xf32, #tpu.memory_space<vmem>>, vector<16x128xf32>
    tpu.vector_store %arg7[%c0_6, %c0_7], %7 {strides = array<i32>} : memref<16x128xf32, #tpu.memory_space<vmem>>, vector<16x128xf32>,
    %c0_i32_8 = arith.constant 0 : i32
    %9 = arith.cmpi eq, %arg2, %c0_i32_8 : i32
    %10 = arith.extui %9 : i1 to i32
    %c0_i32_9 = arith.constant 0 : i32
    %11 = arith.cmpi ne, %10, %c0_i32_9 : i32
    scf.if %11 {
      %c0_10 = arith.constant 0 : index
      %c0_11 = arith.constant 0 : index
      %12 = vector.load %arg7[%c0_10, %c0_11] : memref<16x128xf32, #tpu.memory_space<vmem>>, vector<16x128xf32>
      %c0_12 = arith.constant 0 : index
      %c0_13 = arith.constant 0 : index
      %13 = vector.load %arg5[%c0_12, %c0_13] : memref<1x128xf32, #tpu.memory_space<vmem>>, vector<1x128xf32>
      %14 = vector.broadcast %13 : vector<1x128xf32> to vector<16x128xf32>
      %15 = arith.addf %12, %14 : vector<16x128xf32>
      %c0_14 = arith.constant 0 : index
      %c0_15 = arith.constant 0 : index
      %16 = vector.load %arg6[%c0_14, %c0_15] : memref<16x128xf32, #tpu.memory_space<vmem>>, vector<16x128xf32>
      tpu.vector_store %arg6[%c0_14, %c0_15], %15 {strides = array<i32>} : memref<16x128xf32, #tpu.memory_space<vmem>>, vector<16x128xf32>,
    } else {
    }
    return
  }
  func.func @transform_0(%arg0: i32, %arg1: i32, %arg2: i32) -> (i32, i32) {
    %c0_i32 = arith.constant 0 : i32
    return %arg0, %arg2 : i32, i32
  }
  func.func @transform_1(%arg0: i32, %arg1: i32, %arg2: i32) -> (i32, i32) {
    %c0_i32 = arith.constant 0 : i32
    return %arg2, %arg1 : i32, i32
  }
  func.func @transform_2(%arg0: i32, %arg1: i32, %arg2: i32) -> (i32, i32) {
    %c0_i32 = arith.constant 0 : i32
    %c0_i32_0 = arith.constant 0 : i32
    return %c0_i32, %arg1 : i32, i32
  }
  func.func @transform_3(%arg0: i32, %arg1: i32, %arg2: i32) -> (i32, i32) {
    %c0_i32 = arith.constant 0 : i32
    return %arg0, %arg1 : i32, i32
  }
}

</mosaic_0001>

<bundles_post_ra>
// kernel: tpu_custom_call.1
= control target key start
LH: loop header
LB: loop body
LE: loop exit
PB: predicated region body
PF: predicated region fallthrough
CT: control target
= control target key end

     0   :  { %8 = vsyncpa [#allocation4], 0  ;;  %s418_s0 = inlined_call_operand.hbm [shape: f32[16,128], index: 0, kind: input, shape index: {}]   ;;  %s419_s1 = inlined_call_operand.hbm [shape: f32[128,128], index: 1, kind: input, shape index: {}]   ;;  %s420_s2 = inlined_call_operand.vmem [shape: f32[1,128], index: 2, kind: input, shape index: {}]   ;;  %s421_s3 = inlined_call_operand.hbm [shape: f32[16,128], index: 3, kind: output, shape index: {}]  }
   0x1   :  { %9 = vsyncpa [#allocation7], 0 }
   0x2   :  { %10 = vsyncpa [#allocation5], 0  ;;  %s345_s12 = smov [#allocation3]   ;;  %s273_s16 = scalar_lea.hbm %s418_s0, 256 }
   0x3   :  { %s16_s13 = sshll.u32 %s345_s12, 4  ;;  %p274_p0 = scmp.ne.s32.totalorder %s418_s0, %s273_s16  ;;  %s17_s13 = int_to_ptr.vmem [resolvable:$true] %s16_s13 }
   0x4   :  { %p277_p1 = scmp.lt.u32.totalorder %s273_s16, %s418_s0 }
   0x6   :  { %p279_p2 = pnand %p277_p1, %p274_p0 }
   0x8   :  { %282 = shalt.err (!%p279_p2)
}
   0x9   :  { %s283_s21 = scalar_lea.vmem %s17_s13, 256  ;;  %p288_p4 = scmp.lt.s32.totalorder %s17_s13, %s17_s13 }
   0xa   :  { %p284_p3 = scmp.ne.s32.totalorder %s17_s13, %s283_s21  ;;  %p289_p5 = scmp.lt.s32.totalorder %s283_s21, %s283_s21 }
   0xc   :  { %p290_p6 = por %p289_p5, %p288_p4 }
   0xe   :  { %p291_p7 = pnand %p290_p6, %p284_p3 }
  0x10   :  { %294 = shalt.err (!%p291_p7)
}
  0x11   :  { %s346_s22 = smov 128   ;;  %s347_s23 = smov 8  }
  0x12   :  { %22 = dma.hbm_to_vmem [thread:$0]  %s418_s0, 256, %s17_s13, [#allocation4], %s346_s22, %s346_s22, %s347_s23  }
  0x13   :  { %s348_s26 = smov [#allocation6]   ;;  %s295_s30 = scalar_lea.hbm %s419_s1, 2048 }
  0x14   :  { %s28_s27 = sshll.u32 %s348_s26, 4  ;;  %p296_p8 = scmp.ne.s32.totalorder %s419_s1, %s295_s30  ;;  %s29_s27 = int_to_ptr.vmem [resolvable:$true] %s28_s27 }
  0x15   :  { %p299_p9 = scmp.lt.u32.totalorder %s295_s30, %s419_s1 }
  0x17   :  { %p301_p10 = pnand %p299_p9, %p296_p8 }
  0x19   :  { %304 = shalt.err (!%p301_p10)
}
  0x1a   :  { %s305_s8 = scalar_lea.vmem %s29_s27, 2048  ;;  %p310_p12 = scmp.lt.s32.totalorder %s29_s27, %s29_s27 }
  0x1b   :  { %p306_p11 = scmp.ne.s32.totalorder %s29_s27, %s305_s8  ;;  %p311_p13 = scmp.lt.s32.totalorder %s305_s8, %s305_s8 }
  0x1d   :  { %p312_p0 = por %p311_p13, %p310_p12 }
  0x1f   :  { %p313_p1 = pnand %p312_p0, %p306_p11 }
  0x21   :  { %316 = shalt.err (!%p313_p1)
}
  0x22   :  { %34 = dma.hbm_to_vmem [thread:$0]  %s419_s1, 2048, %s29_s27, [#allocation7], %s346_s22, %s346_s22, %s347_s23  }
  0x23   :  { %339 = dma.done.wait [#allocation4], 256  }
  0x24   :  { %340 = vsyncadd [#allocation4], 4294967040 }
  0x25   :  { %341 = dma.done.wait [#allocation7], 2048  }
  0x26   :  { %342 = vsyncadd [#allocation7], 4294965248  ;;  %v53_v0 = vld [vmem:[#allocation6] sm:$0xff]  ;;  %v54_v1 = vld [vmem:[#allocation6 + $0x8] sm:$0xff]  ;;  %s349_s11 = smov [#allocation8]  }
  0x27   :  { %v55_v2 = vld [vmem:[#allocation6 + $0x10] sm:$0xff]  ;;  %v236_v3 = vpack.c.bf16 %v54_v1, %v53_v0  ;;  %v56_v4 = vld [vmem:[#allocation6 + $0x18] sm:$0xff]  ;;  %v57_v6 = vld [vmem:[#allocation6 + $0x20] sm:$0xff]  ;;  %s169_s12 = sshll.u32 %s349_s11, 4  ;;  %s170_s12 = int_to_ptr.vmem [resolvable:$true] %s169_s12 }
  0x28   :  { %v240_v5 = vpack.c.bf16 %v56_v4, %v55_v2  ;;  %v58_v7 = vld [vmem:[#allocation6 + $0x28] sm:$0xff]  ;;  %v51_v9 = vld [vmem:[#allocation3] sm:$0xff]  ;;  %v60_v11 = vld [vmem:[#allocation6 + $0x38] sm:$0xff]  ;;  %s317_s13 = scalar_lea.vmem %s170_s12, 256  ;;  %p322_p3 = scmp.lt.s32.totalorder %s170_s12, %s170_s12 }
  0x29   :  { %237 = vmatprep.subr.bf16.mxu0 %v236_v3  ;;  %v244_v8 = vpack.c.bf16 %v58_v7, %v57_v6  ;;  %v59_v10 = vld [vmem:[#allocation6 + $0x30] sm:$0xff]  ;;  %233 = vmatprep.mubr.f32.mxu0 %v51_v9  ;;  %v61_v13 = vld [vmem:[#allocation6 + $0x40] sm:$0xff]  ;;  %v62_v14 = vld [vmem:[#allocation6 + $0x48] sm:$0xff]  ;;  %p318_p2 = scmp.ne.s32.totalorder %s170_s12, %s317_s13  ;;  %p323_p4 = scmp.lt.s32.totalorder %s317_s13, %s317_s13 }
  0x2a   :  { %239 = vmatpush3.bf16.msra.mxu0 %v236_v3  ;;  %v248_v12 = vpack.c.bf16 %v60_v11, %v59_v10  ;;  %v252_v15 = vpack.c.bf16 %v62_v14, %v61_v13  ;;  %v63_v16 = vld [vmem:[#allocation6 + $0x50] sm:$0xff]  ;;  %v64_v17 = vld [vmem:[#allocation6 + $0x58] sm:$0xff]  ;;  %v65_v19 = vld [vmem:[#allocation6 + $0x60] sm:$0xff] }
  0x2b   :  { %241 = vmatprep.subr.bf16.mxu0 %v240_v5  ;;  %v256_v18 = vpack.c.bf16 %v64_v17, %v63_v16  ;;  %v66_v20 = vld [vmem:[#allocation6 + $0x68] sm:$0xff]  ;;  %v67_v22 = vld [vmem:[#allocation6 + $0x70] sm:$0xff]  ;;  %v68_v23 = vld [vmem:[#allocation6 + $0x78] sm:$0xff]  ;;  %p324_p5 = por %p323_p4, %p322_p3 }
  0x2c   :  { %v260_v21 = vpack.c.bf16 %v66_v20, %v65_v19  ;;  %v264_v24 = vpack.c.bf16 %v68_v23, %v67_v22  ;;  %v52_v25 = vld [vmem:[#allocation3 + $0x8] sm:$0xff]  ;;  %v182_v26 = vld [vmem:[%s420_s2] ss:$0 sm:$0xff] }
  0x2d   :  { %p325_p6 = pnand %p324_p5, %p318_p2 }
  0x2e   :  { %243 = vmatpush3.bf16.msra.mxu0 %v240_v5 }
  0x2f   :  { %245 = vmatprep.subr.bf16.mxu0 %v244_v8 }
  0x32   :  { %247 = vmatpush3.bf16.msra.mxu0 %v244_v8 }
  0x33   :  { %249 = vmatprep.subr.bf16.mxu0 %v248_v12 }
  0x36   :  { %251 = vmatpush3.bf16.msra.mxu0 %v248_v12 }
  0x37   :  { %253 = vmatprep.subr.bf16.mxu0 %v252_v15 }
  0x3a   :  { %255 = vmatpush3.bf16.msra.mxu0 %v252_v15 }
  0x3b   :  { %257 = vmatprep.subr.bf16.mxu0 %v256_v18 }
  0x3e   :  { %259 = vmatpush3.bf16.msra.mxu0 %v256_v18 }
  0x3f   :  { %261 = vmatprep.subr.bf16.mxu0 %v260_v21 }
  0x42   :  { %263 = vmatpush3.bf16.msra.mxu0 %v260_v21 }
  0x43   :  { %265 = vmatprep.subr.bf16.mxu0 %v264_v24 }
  0x46   :  { %267 = vmatpush3.bf16.msra.mxu0 %v264_v24 }
  0x49   :  { %234 = vmatmul.mubr.f32.vlgmr.msra.gmra.mrb[0].mxu0 %v52_v25 }
 0x11c   :  { %v235_v27 = vpop.f32.mrb[0].mxu0 }
 0x11d   :  { %v161_v28 = vadd.f32 %v235_v27, %v182_v26  ;;  %v135_v29 = vpop.f32.mrb[1].mxu0 }
 0x11e   :  { %v160_v30 = vadd.f32 %v182_v26, %v135_v29 }
 0x11f   :  { %163 = vst [vmem:[#allocation8 + $0x8] sm:$0xff] %v161_v28 }
 0x120   :  { %162 = vst [vmem:[#allocation8] sm:$0xff] %v160_v30 }
 0x121   :  { %328 = shalt.err (!%p325_p6)
}
 0x122   :  { %s329_s2 = scalar_lea.hbm %s421_s3, 256 }
 0x123   :  { %p330_p7 = scmp.ne.s32.totalorder %s421_s3, %s329_s2  ;;  %p333_p8 = scmp.lt.u32.totalorder %s329_s2, %s421_s3 }
 0x125   :  { %p335_p9 = pnand %p333_p8, %p330_p7 }
 0x127   :  { %338 = shalt.err (!%p335_p9)
}
 0x128   :  { %175 = dma.vmem_to_hbm [thread:$0]  %s170_s12, 256, %s421_s3, [#allocation5], %s346_s22, %s346_s22, %s347_s23  }
 0x129   :  { %343 = dma.done.wait [#allocation5], 256  }
 0x12a   :  { %344 = vsyncadd [#allocation5], 4294967040 }
 0x12b   :  { %179 = vsyncpa [#allocation4], 1 }
 0x12c   :  { %180 = vsyncpa [#allocation7], 1 }
 0x12d   :  { %181 = vsyncpa [#allocation5], 1 }

</bundles_post_ra>
